<compile_context>
chip_gen: v7x
topology: tpu7x:2x2x1
jax: 0.10.0
libtpu: 0.0.40
codegen_flags: <defaults>
</compile_context>

<pallas_src>
import functools

import jax
import jax.numpy as jnp
from jax.experimental import pallas as pl
from jax.experimental.pallas import tpu as pltpu

_LANES = 128
_MAX_BLOCK_ROWS = 8192   # 4 MiB per f32 input per buffer; multiple of 16 (bf16 tiles ok)


def _wbce_elem_loss(p_raw, t_raw):
    """Per-element weighted BCE (PyTorch binary_cross_entropy semantics)."""
    p = p_raw.astype(jnp.float32)
    t = t_raw.astype(jnp.float32)
    # Clamp logs at -100 *before* any multiply (PyTorch behavior; also keeps
    # p==0 / p==1 finite).
    log_p = jnp.maximum(jnp.log(p), jnp.float32(-100.0))
    log_1mp = jnp.maximum(jnp.log(1.0 - p), jnp.float32(-100.0))
    # signed weight: -0.9 where t==1, -0.1 where t==0, -1.0 otherwise
    ws = jnp.where(t == 1.0, jnp.float32(-0.9),
                   jnp.where(t == 0.0, jnp.float32(-0.1), jnp.float32(-1.0)))
    # algebraically == -w * (t*log_p + (1-t)*log_1mp)
    return ws * (t * (log_p - log_1mp) + log_1mp)


def _wbce_kernel(pred_ref, targ_ref, out_ref, acc_ref, *,
                 rows_full, block_rows, nblocks):
    j = pl.program_id(0)
    last = nblocks - 1
    rows_in_last = rows_full - last * block_rows

    @pl.when(j == 0)
    def _():
        acc_ref[...] = jnp.zeros_like(acc_ref)

    loss = _wbce_elem_loss(pred_ref[...], targ_ref[...])

    def accumulate(x):
        # Fold into the vreg-shaped accumulator: pure VPU adds, no cross-lane op.
        if block_rows % 8 == 0:
            acc_ref[...] += jnp.sum(x.reshape(block_rows // 8, 8, _LANES), axis=0)
        else:
            # only reachable for tiny single-block inputs
            acc_ref[0:1, :] += jnp.sum(x, axis=0, keepdims=True)

    if rows_in_last == block_rows:
        # All blocks are full: unmasked fast path on every step.
        accumulate(loss)
    else:
        @pl.when(j < last)
        def _():
            accumulate(loss)

        @pl.when(j == last)
        def _():
            # Row-threshold mask only on the partial last block. Garbage rows
            # (from the out-of-bounds part of the block) may be NaN/Inf in
            # `loss`, but the select zeroes them before the sum.
            rows_i = jax.lax.broadcasted_iota(jnp.int32, (block_rows, _LANES), 0)
            accumulate(jnp.where(rows_i < rows_in_last, loss, jnp.float32(0.0)))

    @pl.when(j == last)
    def _():
        # single cross-lane reduce for the whole kernel
        out_ref[0, 0] = jnp.sum(acc_ref[...])


def weighted_bce_loss(predict, target):
    assert predict.shape == target.shape, (predict.shape, target.shape)
    total = predict.size
    if total == 0:
        return jnp.float32(0.0)

    p_flat = predict.reshape(-1)
    t_flat = target.reshape(-1)

    rows_full = total // _LANES
    tail = total - rows_full * _LANES

    # <128-element lane tail: reduce it in plain JAX (avoids padding both full
    # inputs through HBM just for a handful of elements).
    tail_sum = jnp.float32(0.0)
    if tail:
        # TODO(synk): the prefix/suffix slices below still copy the inputs once
        # in the rare non-multiple-of-128 case; a fully copy-free path would
        # need a BoundedSlice last block.
        tail_sum = jnp.sum(_wbce_elem_loss(p_flat[rows_full * _LANES:],
                                           t_flat[rows_full * _LANES:]))
        if rows_full == 0:
            return tail_sum / jnp.float32(total)
        p_main = p_flat[: rows_full * _LANES]
        t_main = t_flat[: rows_full * _LANES]
    else:
        p_main = p_flat
        t_main = t_flat

    # Lane-dense slab in the inputs' native dtype (kernel upcasts per block).
    p2 = p_main.reshape(rows_full, _LANES)
    t2 = t_main.reshape(rows_full, _LANES)

    block_rows = rows_full if rows_full <= _MAX_BLOCK_ROWS else _MAX_BLOCK_ROWS
    nblocks = pl.cdiv(rows_full, block_rows)

    kernel = functools.partial(_wbce_kernel, rows_full=rows_full,
                               block_rows=block_rows, nblocks=nblocks)

    # TODO(synk): on v7x a leading CORE_PARALLEL axis (or pl.core_map over
    # pltpu.create_tensorcore_mesh) could shard this stream over both
    # TensorCores; plain "parallel" does not, so keep one serial axis here.
    partial_sum = pl.pallas_call(
        kernel,
        out_shape=jax.ShapeDtypeStruct((1, 1), jnp.float32),
        grid_spec=pltpu.PrefetchScalarGridSpec(
            num_scalar_prefetch=0,
            grid=(nblocks,),
            in_specs=[
                pl.BlockSpec((block_rows, _LANES), lambda j: (j, 0)),
                pl.BlockSpec((block_rows, _LANES), lambda j: (j, 0)),
            ],
            out_specs=pl.BlockSpec((1, 1), lambda j: (0, 0),
                                   memory_space=pltpu.MemorySpace.SMEM),
            scratch_shapes=[pltpu.VMEM((8, _LANES), jnp.float32)],
        ),
        compiler_params=pltpu.CompilerParams(
            dimension_semantics=("arbitrary",),
            vmem_limit_bytes=32 * 1024 * 1024,
        ),
    )(p2, t2)

    return (partial_sum[0, 0] + tail_sum) / jnp.float32(total)


def _reference(predict, target):
    p = predict.astype(jnp.float32)
    t = target.astype(jnp.float32)
    w = jnp.where(t == 1.0, 0.9, jnp.where(t == 0.0, 0.1, 1.0)).astype(jnp.float32)
    log_p = jnp.maximum(jnp.log(p), -100.0)
    log_1mp = jnp.maximum(jnp.log(1.0 - p), -100.0)
    return jnp.mean(-w * (t * log_p + (1.0 - t) * log_1mp))


if __name__ == "__main__":
    key = jax.random.PRNGKey(0)
    k1, k2, k3 = jax.random.split(key, 3)

    # NCHW inputs, small shapes
    shape = (2, 4, 16, 16)
    # predictions strictly inside (0,1) (like sigmoid outputs)
    predict = jax.random.uniform(k1, shape, jnp.float32, 0.01, 0.99)

    # target is mask-like: mix of exact 0.0, exact 1.0, and other values in (0,1)
    raw = jax.random.uniform(k2, shape, dtype=jnp.float32)
    sel = jax.random.randint(k3, shape, 0, 3)
    target = jnp.where(sel == 0, 0.0,
                       jnp.where(sel == 1, 1.0, raw)).astype(jnp.float32)

    loss = weighted_bce_loss(predict, target)
    jax.block_until_ready(loss)

    ref = _reference(predict, target)
    assert jnp.allclose(loss, ref, rtol=1e-5, atol=1e-6), (loss, ref)

    print("KERNEL_OK")
</pallas_src>

<mosaic_0001>
module attributes {stable_mosaic.version = 11 : i64} {
  func.func @_wbce_kernel(%arg0: i32, %arg1: memref<16x128xf32, #tpu.memory_space<vmem>>, %arg2: memref<16x128xf32, #tpu.memory_space<vmem>>, %arg3: memref<1x1xf32, #tpu.memory_space<smem>>, %arg4: memref<8x128xf32, #tpu.memory_space<vmem>>) attributes {dimension_semantics = [#tpu.dimension_semantics<arbitrary>], iteration_bounds = array<i64: 1>, scalar_prefetch = 0 : i64, scratch_operands = 1 : i64, tpu.core_type = #tpu.core_type<tc>, window_params = [{transform_indices = @transform_0, window_bounds = array<i64: 16, 128>}, {transform_indices = @transform_1, window_bounds = array<i64: 16, 128>}, {transform_indices = @transform_2, window_bounds = array<i64: 1, 1>}]} {
    %c0_i32 = arith.constant 0 : i32
    %0 = arith.cmpi eq, %arg0, %c0_i32 : i32
    %1 = arith.extui %0 : i1 to i32
    %c0_i32_0 = arith.constant 0 : i32
    %2 = arith.cmpi ne, %1, %c0_i32_0 : i32
    scf.if %2 {
      %cst_18 = arith.constant 0.000000e+00 : f32
      %34 = vector.broadcast %cst_18 : f32 to vector<8x128xf32>
      %c0_19 = arith.constant 0 : index
      %c0_20 = arith.constant 0 : index
      %35 = vector.load %arg4[%c0_19, %c0_20] : memref<8x128xf32, #tpu.memory_space<vmem>>, vector<8x128xf32>
      tpu.vector_store %arg4[%c0_19, %c0_20], %34 {strides = array<i32>} : memref<8x128xf32, #tpu.memory_space<vmem>>, vector<8x128xf32>,
    } else {
    }
    %c0 = arith.constant 0 : index
    %c0_1 = arith.constant 0 : index
    %3 = vector.load %arg1[%c0, %c0_1] : memref<16x128xf32, #tpu.memory_space<vmem>>, vector<16x128xf32>
    %c0_2 = arith.constant 0 : index
    %c0_3 = arith.constant 0 : index
    %4 = vector.load %arg2[%c0_2, %c0_3] : memref<16x128xf32, #tpu.memory_space<vmem>>, vector<16x128xf32>
    %5 = math.log %3 : vector<16x128xf32>
    %cst = arith.constant -1.000000e+02 : f32
    %6 = vector.broadcast %cst : f32 to vector<16x128xf32>
    %7 = arith.maximumf %5, %6 : vector<16x128xf32>
    %cst_4 = arith.constant 1.000000e+00 : f32
    %8 = vector.broadcast %cst_4 : f32 to vector<16x128xf32>
    %9 = arith.subf %8, %3 : vector<16x128xf32>
    %10 = math.log %9 : vector<16x128xf32>
    %cst_5 = arith.constant -1.000000e+02 : f32
    %11 = vector.broadcast %cst_5 : f32 to vector<16x128xf32>
    %12 = arith.maximumf %10, %11 : vector<16x128xf32>
    %cst_6 = arith.constant 1.000000e+00 : f32
    %13 = vector.broadcast %cst_6 : f32 to vector<16x128xf32>
    %14 = arith.cmpf oeq, %4, %13 : vector<16x128xf32>
    %cst_7 = arith.constant 0.000000e+00 : f32
    %15 = vector.broadcast %cst_7 : f32 to vector<16x128xf32>
    %16 = arith.cmpf oeq, %4, %15 : vector<16x128xf32>
    %cst_8 = arith.constant -1.000000e-01 : f32
    %cst_9 = arith.constant -1.000000e+00 : f32
    %17 = vector.broadcast %cst_8 : f32 to vector<16x128xf32>
    %18 = vector.broadcast %cst_9 : f32 to vector<16x128xf32>
    %19 = arith.select %16, %17, %18 : vector<16x128xi1>, vector<16x128xf32>
    %cst_10 = arith.constant -0.899999976 : f32
    %20 = vector.broadcast %cst_10 : f32 to vector<16x128xf32>
    %21 = arith.select %14, %20, %19 : vector<16x128xi1>, vector<16x128xf32>
    %22 = arith.subf %7, %12 : vector<16x128xf32>
    %23 = arith.mulf %4, %22 : vector<16x128xf32>
    %24 = arith.addf %23, %12 : vector<16x128xf32>
    %25 = arith.mulf %21, %24 : vector<16x128xf32>
    %c0_11 = arith.constant 0 : index
    %c0_12 = arith.constant 0 : index
    %26 = vector.load %arg4[%c0_11, %c0_12] : memref<8x128xf32, #tpu.memory_space<vmem>>, vector<8x128xf32>
    %27 = vector.shape_cast %25 : vector<16x128xf32> to vector<2x8x128xf32>
    %cst_13 = arith.constant dense<0.000000e+00> : vector<8x128xf32>
    %28 = vector.multi_reduction <add>, %27, %cst_13 [0] : vector<2x8x128xf32> to vector<8x128xf32>
    %29 = arith.addf %26, %28 : vector<8x128xf32>
    %c0_14 = arith.constant 0 : index
    %c0_15 = arith.constant 0 : index
    %30 = vector.load %arg4[%c0_14, %c0_15] : memref<8x128xf32, #tpu.memory_space<vmem>>, vector<8x128xf32>
    tpu.vector_store %arg4[%c0_14, %c0_15], %29 {strides = array<i32>} : memref<8x128xf32, #tpu.memory_space<vmem>>, vector<8x128xf32>,
    %c0_i32_16 = arith.constant 0 : i32
    %31 = arith.cmpi eq, %arg0, %c0_i32_16 : i32
    %32 = arith.extui %31 : i1 to i32
    %c0_i32_17 = arith.constant 0 : i32
    %33 = arith.cmpi ne, %32, %c0_i32_17 : i32
    scf.if %33 {
      %c0_18 = arith.constant 0 : index
      %c0_19 = arith.constant 0 : index
      %34 = vector.load %arg4[%c0_18, %c0_19] : memref<8x128xf32, #tpu.memory_space<vmem>>, vector<8x128xf32>
      %35 = vector.shape_cast %34 : vector<8x128xf32> to vector<1x8x128xf32>
      %cst_20 = arith.constant dense<0.000000e+00> : vector<1xf32>
      %36 = vector.multi_reduction <add>, %35, %cst_20 [1, 2] : vector<1x8x128xf32> to vector<1xf32>
      %37 = vector.shape_cast %36 : vector<1xf32> to vector<1x1x1xf32>
      %38 = vector.extract %37[0, 0, 0] : f32 from vector<1x1x1xf32>
      %c0_21 = arith.constant 0 : index
      %c0_22 = arith.constant 0 : index
      %39 = memref.load %arg3[%c0_21, %c0_22] : memref<1x1xf32, #tpu.memory_space<smem>>
      memref.store %38, %arg3[%c0_21, %c0_22] : memref<1x1xf32, #tpu.memory_space<smem>>
    } else {
    }
    return
  }
  func.func @transform_0(%arg0: i32) -> (i32, i32) {
    %c0_i32 = arith.constant 0 : i32
    %c0_i32_0 = arith.constant 0 : i32
    return %arg0, %c0_i32 : i32, i32
  }
  func.func @transform_1(%arg0: i32) -> (i32, i32) {
    %c0_i32 = arith.constant 0 : i32
    %c0_i32_0 = arith.constant 0 : i32
    return %arg0, %c0_i32 : i32, i32
  }
  func.func @transform_2(%arg0: i32) -> (i32, i32) {
    %c0_i32 = arith.constant 0 : i32
    %c0_i32_0 = arith.constant 0 : i32
    %c0_i32_1 = arith.constant 0 : i32
    return %c0_i32, %c0_i32_0 : i32, i32
  }
}

</mosaic_0001>

<bundles_post_ra>
// kernel: tpu_custom_call.1
= control target key start
LH: loop header
LB: loop body
LE: loop exit
PB: predicated region body
PF: predicated region fallthrough
CT: control target
= control target key end

     0   :  { %7 = vsyncpa [#allocation4], 0  ;;  %s246_s0 = inlined_call_operand.hbm [shape: f32[16,128], index: 0, kind: input, shape index: {}]   ;;  %s247_s1 = inlined_call_operand.hbm [shape: f32[16,128], index: 1, kind: input, shape index: {}]   ;;  %s248_s2 = inlined_call_operand.hbm [shape: f32[1,1], index: 2, kind: output, shape index: {}]  }
   0x1   :  { %8 = vsyncpa [#allocation7], 0 }
   0x2   :  { %9 = vsyncpa [#allocation5], 0  ;;  %s189_s9 = smov [#allocation3]   ;;  %s129_s13 = scalar_lea.hbm %s246_s0, 256 }
   0x3   :  { %s15_s10 = sshll.u32 %s189_s9, 4  ;;  %p130_p0 = scmp.ne.s32.totalorder %s246_s0, %s129_s13  ;;  %s16_s10 = int_to_ptr.vmem [resolvable:$true] %s15_s10 }
   0x4   :  { %p133_p1 = scmp.lt.u32.totalorder %s129_s13, %s246_s0 }
   0x6   :  { %p135_p2 = pnand %p133_p1, %p130_p0 }
   0x8   :  { %138 = shalt.err (!%p135_p2)
}
   0x9   :  { %s139_s18 = scalar_lea.vmem %s16_s10, 256  ;;  %p144_p4 = scmp.lt.s32.totalorder %s16_s10, %s16_s10 }
   0xa   :  { %p140_p3 = scmp.ne.s32.totalorder %s16_s10, %s139_s18  ;;  %p145_p5 = scmp.lt.s32.totalorder %s139_s18, %s139_s18 }
   0xc   :  { %p146_p6 = por %p145_p5, %p144_p4 }
   0xe   :  { %p147_p7 = pnand %p146_p6, %p140_p3 }
  0x10   :  { %150 = shalt.err (!%p147_p7)
}
  0x11   :  { %s190_s19 = smov 128   ;;  %s191_s20 = smov 8  }
  0x12   :  { %21 = dma.hbm_to_vmem [thread:$0]  %s246_s0, 256, %s16_s10, [#allocation4], %s190_s19, %s190_s19, %s191_s20  }
  0x13   :  { %s192_s23 = smov [#allocation6]   ;;  %s151_s27 = scalar_lea.hbm %s247_s1, 256 }
  0x14   :  { %s27_s24 = sshll.u32 %s192_s23, 4  ;;  %p152_p8 = scmp.ne.s32.totalorder %s247_s1, %s151_s27  ;;  %s28_s24 = int_to_ptr.vmem [resolvable:$true] %s27_s24 }
  0x15   :  { %p155_p9 = scmp.lt.u32.totalorder %s151_s27, %s247_s1 }
  0x17   :  { %p157_p10 = pnand %p155_p9, %p152_p8 }
  0x19   :  { %160 = shalt.err (!%p157_p10)
}
  0x1a   :  { %s161_s4 = scalar_lea.vmem %s28_s24, 256  ;;  %p166_p12 = scmp.lt.s32.totalorder %s28_s24, %s28_s24 }
  0x1b   :  { %p162_p11 = scmp.ne.s32.totalorder %s28_s24, %s161_s4  ;;  %p167_p13 = scmp.lt.s32.totalorder %s161_s4, %s161_s4 }
  0x1d   :  { %p168_p0 = por %p167_p13, %p166_p12 }
  0x1f   :  { %p169_p1 = pnand %p168_p0, %p162_p11 }
  0x21   :  { %172 = shalt.err (!%p169_p1)
}
  0x22   :  { %33 = dma.hbm_to_vmem [thread:$0]  %s247_s1, 256, %s28_s24, [#allocation7], %s190_s19, %s190_s19, %s191_s20  }
  0x23   :  { %183 = dma.done.wait [#allocation4], 256  }
  0x24   :  { %184 = vsyncadd [#allocation4], 4294967040 }
  0x25   :  { %185 = dma.done.wait [#allocation7], 256  }
  0x26   :  { %186 = vsyncadd [#allocation7], 4294967040  ;;  %v45_v0 = vld [vmem:[#allocation3] sm:$0xff]  ;;  %v46_v1 = vld [vmem:[#allocation3 + $0x8] sm:$0xff]  ;;  %v193_v18 = vmov -1.0   ;;  %s173_s8 = scalar_lea.hbm %s248_s2, 16 }
  0x27   :  { %121 = vlog2.f32 %v45_v0  ;;  %v55_v2 = vsub.f32 1.0, %v45_v0  ;;  %v56_v3 = vsub.f32 1.0, %v46_v1  ;;  %v47_v6 = vld [vmem:[#allocation6] sm:$0xff]  ;;  %v48_v9 = vld [vmem:[#allocation6 + $0x8] sm:$0xff]  ;;  %p174_p2 = scmp.ne.s32.totalorder %s248_s2, %s173_s8  ;;  %p177_p3 = scmp.lt.u32.totalorder %s173_s8, %s248_s2 }
  0x28   :  { %123 = vlog2.f32 %v46_v1  ;;  %vm65_vm0 = vcmp.eq.f32.partialorder %v47_v6, 0.0  ;;  %vm66_vm1 = vcmp.eq.f32.partialorder %v48_v9, 0.0  ;;  %vm63_vm2 = vcmp.eq.f32.partialorder %v47_v6, 1.0 }
  0x29   :  { %125 = vlog2.f32 %v55_v2  ;;  %v67_v19 = vsel %vm65_vm0, -0.1, %v193_v18  ;;  %vm64_vm3 = vcmp.eq.f32.partialorder %v48_v9, 1.0  ;;  %v68_v21 = vsel %vm66_vm1, -0.1, %v193_v18  ;;  %p179_p4 = pnand %p177_p3, %p174_p2 }
  0x2a   :  { %127 = vlog2.f32 %v56_v3  ;;  %v69_v24 = vsel %vm63_vm2, -0.9, %v67_v19  ;;  %v70_v26 = vsel %vm64_vm3, -0.9, %v68_v21 }
  0x31   :  { %v122_v4 = vpop.eup %121 }
  0x32   :  { %v124_v5 = vpop.eup %123  ;;  %v50_v7 = vmul.f32 0.6931472, %v122_v4 }
  0x33   :  { %v126_v8 = vpop.eup %125  ;;  %v52_v10 = vmul.f32 0.6931472, %v124_v5 }
  0x34   :  { %v128_v11 = vpop.eup %127  ;;  %v53_v12 = vmax.f32 %v50_v7, -100.0  ;;  %v58_v13 = vmul.f32 0.6931472, %v126_v8 }
  0x35   :  { %v54_v14 = vmax.f32 %v52_v10, -100.0  ;;  %v60_v15 = vmul.f32 0.6931472, %v128_v11 }
  0x36   :  { %v61_v16 = vmax.f32 %v58_v13, -100.0 }
  0x37   :  { %v62_v17 = vmax.f32 %v60_v15, -100.0 }
  0x38   :  { %v71_v20 = vsub.f32 %v53_v12, %v61_v16 }
  0x39   :  { %v72_v22 = vsub.f32 %v54_v14, %v62_v17 }
  0x3a   :  { %v73_v23 = vmul.f32 %v71_v20, %v47_v6 }
  0x3b   :  { %v74_v25 = vmul.f32 %v72_v22, %v48_v9 }
  0x3c   :  { %v75_v27 = vadd.f32 %v73_v23, %v61_v16 }
  0x3d   :  { %v76_v28 = vadd.f32 %v74_v25, %v62_v17 }
  0x3e   :  { %v77_v29 = vmul.f32 %v75_v27, %v69_v24 }
  0x3f   :  { %v78_v30 = vmul.f32 %v76_v28, %v70_v26 }
  0x41   :  { %v80_v31 = vadd.f32 %v78_v30, %v77_v29 }
  0x43   :  { %87 = vadd.xlane.f32.xlu0 %v80_v31 }
  0xd0   :  { %v88_v32 = vpop.xlane.xlu0 %87 }
  0xd1   :  { %v89_v33 = vrot.slane %v88_v32, 4 }
  0xd3   :  { %v90_v34 = vadd.f32 %v89_v33, %v88_v32 }
  0xd5   :  { %v91_v35 = vrot.slane %v90_v34, 2 }
  0xd7   :  { %v92_v36 = vadd.f32 %v91_v35, %v90_v34 }
  0xd9   :  { %v93_v37 = vrot.slane %v92_v36, 1 }
  0xdb   :  { %v94_v38 = vadd.f32 %v93_v37, %v92_v36 }
  0xdd   :  { %113 = vpush %v94_v38 }
 0x10e   :  { %s114_s1 = spop %113 }
 0x10f   :  { %97 = sst [smem:[#allocation8]] %s114_s1 }
 0x110   :  { %182 = shalt.err (!%p179_p4)
}
 0x111   :  { %s194_s13 = smov [#allocation8]  }
 0x112   :  { %105 = dma.smem_to_hbm %s194_s13, 16, %s248_s2, [#allocation5]  }
 0x113   :  { %187 = dma.done.wait [#allocation5], 16  }
 0x114   :  { %188 = vsyncadd [#allocation5], 4294967280 }
 0x115   :  { %109 = sfence }
 0x116   :  { %110 = vsyncpa [#allocation4], 1 }
 0x117   :  { %111 = vsyncpa [#allocation7], 1 }
 0x118   :  { %112 = vsyncpa [#allocation5], 1 }

</bundles_post_ra>
